<compile_context>
chip_gen: v6e
topology: v6e:2x2x1
jax: 0.10.0
libtpu: 0.0.40
codegen_flags: <defaults>
</compile_context>

<pallas_src>
import functools

import jax
import jax.numpy as jnp
import numpy as np
from jax import lax
from jax.experimental import pallas as pl
from jax.experimental.pallas import tpu as pltpu


def _round_up(x, m):
    return ((x + m - 1) // m) * m


def _pad2(rows, cols):
    """Element count of a 2D VMEM tile after (sublane=8, lane=128) padding."""
    return _round_up(max(int(rows), 1), 8) * _round_up(max(int(cols), 1), 128)


def _vmem_capacity_bytes():
    try:
        return int(pltpu.get_tpu_info().vmem_capacity_bytes)
    except Exception:
        return 64 * 1024 * 1024          # conservative (v7x-sized) fallback


def _compiler_params(dim_sem, footprint_bytes, cap):
    limit = max(32 << 20, int(footprint_bytes) + (8 << 20))   # never below the default scope
    limit = min(limit, cap - (4 << 20))                        # never above physical VMEM
    return pltpu.CompilerParams(dimension_semantics=dim_sem,
                                vmem_limit_bytes=int(limit))


# ---------------------------------------------------------------------------
# Tiled linear (x @ W^T + b) kernel -- weights pre-transposed to (d_in, d_out)
# ---------------------------------------------------------------------------
def _linear_kernel(x_ref, wt_ref, b_ref, o_ref, *, bf16):
    x = x_ref[...]
    w = wt_ref[...]
    if bf16:
        x = x.astype(jnp.bfloat16)
        w = w.astype(jnp.bfloat16)
    y = jnp.dot(x, w, preferred_element_type=jnp.float32)
    o_ref[...] = (y + b_ref[...]).astype(o_ref.dtype)


def pallas_linear(x2d, wt, b2, *, tile_m=1024, precision="highest"):
    """x2d: (N, d_in); wt: (d_in, d_out) pre-transposed weight; b2: (1, d_out)."""
    N, d_in = x2d.shape
    d_out = wt.shape[1]
    isz = x2d.dtype.itemsize
    cap = _vmem_capacity_bytes()
    budget = cap // 3

    def fp(tm_):
        per_step = (_pad2(tm_, d_in) + _pad2(tm_, d_out)) * isz
        resident = _pad2(d_in, d_out) * wt.dtype.itemsize + _pad2(1, d_out) * b2.dtype.itemsize
        return 2 * (per_step + resident)          # double-buffered

    tm = min(tile_m, _round_up(N, 8))
    while tm > 8 and fp(tm) > budget:
        tm = max(8, _round_up(tm // 2, 8))
    grid_m = pl.cdiv(N, tm)

    kernel = functools.partial(_linear_kernel, bf16=(precision == "fast"))
    return pl.pallas_call(
        kernel,
        out_shape=jax.ShapeDtypeStruct((N, d_out), x2d.dtype),
        grid=(grid_m,),
        in_specs=[pl.BlockSpec((tm, d_in), lambda i: (i, 0)),
                  pl.BlockSpec((d_in, d_out), lambda i: (0, 0)),   # resident across M tiles
                  pl.BlockSpec((1, d_out), lambda i: (0, 0))],
        out_specs=pl.BlockSpec((tm, d_out), lambda i: (i, 0)),
        compiler_params=_compiler_params(("parallel",), fp(tm), cap),
    )(x2d, wt, b2)


# ---------------------------------------------------------------------------
# Attention kernel: one (batch, Lq-tile) block, heads read along a leading axis
# ---------------------------------------------------------------------------
def _mha_attn_kernel(q_ref, k_ref, v_ref, mask_ref, kmask_ref, out_ref, attn_ref,
                     *, n_head, d_k, d_v, inv_temperature, bf16, approx_recip):
    # q: (1, H, tq, d_k), k: (1, H, Lk, d_k), v: (1, H, Lk, d_v)
    # mask: (1, tq, Lk) int8, kmask: (1, tq, 1) int8
    # out: (1, tq, H*d_v), attn: (H, 1, tq, Lk) f32
    masked = mask_ref[0] != 0                    # shared by all heads (no H replication)
    kmask = kmask_ref[0] != 0
    neg_inf = jnp.float32(-jnp.inf)              # exact torch masked_fill(-inf) semantics

    head_outs = []
    for h in range(n_head):                      # static unroll; leading-axis head reads (free)
        qh = q_ref[0, h] * inv_temperature       # fold 1/temperature into q (O(tq*d_k))
        kh = k_ref[0, h]
        vh = v_ref[0, h]
        if bf16:
            qh = qh.astype(jnp.bfloat16)
            kh = kh.astype(jnp.bfloat16)
            vh = vh.astype(jnp.bfloat16)
        # contract last dims of q and k directly (no in-kernel K transpose)
        scores = lax.dot_general(qh, kh, (((1,), (1,)), ((), ())),
                                 preferred_element_type=jnp.float32)
        scores = jnp.where(masked, neg_inf, scores)
        m = jnp.max(scores, axis=-1, keepdims=True)
        e = jnp.exp(scores - m)
        denom = jnp.sum(e, axis=-1, keepdims=True)
        attn = e * pl.reciprocal(denom, approx=approx_recip)
        attn_ref[h, 0] = attn.astype(attn_ref.dtype)          # lane-dense (tq, Lk) store
        head_outs.append(jnp.dot(attn.astype(vh.dtype), vh,
                                 preferred_element_type=jnp.float32))

    out = jnp.concatenate(head_outs, axis=-1)    # (tq, H*d_v) lane-dense, final permute layout
    out = jnp.where(kmask, 0.0, out)             # masked_fill(k_mask, 0)
    out_ref[0] = out.astype(out_ref.dtype)


def _q_index_map(hblk):
    return lambda b, qi: (b, hblk, qi, 0)


def _kv_index_map(hblk):
    return lambda b, qi: (b, hblk, 0, 0)


def pallas_mha_attention(q_hm, k_hm, v_hm, mask_i8, kmask_i8, *, n_head, d_k, d_v,
                         inv_temperature, q_hblk=0, k_hblk=0, v_hblk=0,
                         tile_q=512, precision="highest"):
    """Head-major inputs: q_hm (B, >=H, Lq, d_k); k_hm/v_hm (B, >=H, Lk, d_k/d_v).
    q_hm/k_hm/v_hm may all be the SAME fused (B, 3H, L, d) array (q_hblk/k_hblk/v_hblk select
    the head-block)."""
    B = q_hm.shape[0]
    Lq = q_hm.shape[2]
    Lk = k_hm.shape[2]
    H = n_head
    isz = q_hm.dtype.itemsize
    cap = _vmem_capacity_bytes()
    budget = cap // 2

    def fp(tq_):
        qb = H * _pad2(tq_, d_k) * isz
        kb = H * _pad2(Lk, d_k) * isz
        vb = H * _pad2(Lk, d_v) * isz
        mb = _pad2(tq_, Lk)                  # int8 mask
        kmb = _pad2(tq_, 1)
        ob = _pad2(tq_, H * d_v) * isz
        ab = H * _pad2(tq_, Lk) * 4          # attn written back as f32
        return 2 * (qb + kb + vb + mb + kmb + ob + ab)     # double-buffered

    tq = min(tile_q, _round_up(Lq, 8))
    while tq > 8 and fp(tq) > budget:
        tq = max(8, _round_up(tq // 2, 8))
    n_q = pl.cdiv(Lq, tq)
    # TODO(synk): for very long Lk add a flash-style (online-softmax) Lk grid axis; here K/V
    #             stay resident per batch element and only Lq is tiled (the full attn matrix
    #             must be returned anyway, which caps what that tiling could save).
    # TODO(synk): pad Lk / H*d_v to multiples of 128 for fully unmasked vst when the caller
    #             can tolerate padded return shapes.

    bf16 = precision == "fast"
    kernel = functools.partial(_mha_attn_kernel, n_head=H, d_k=d_k, d_v=d_v,
                               inv_temperature=inv_temperature, bf16=bf16,
                               approx_recip=bf16)
    out, attn = pl.pallas_call(
        kernel,
        out_shape=(jax.ShapeDtypeStruct((B, Lq, H * d_v), q_hm.dtype),
                   jax.ShapeDtypeStruct((H, B, Lq, Lk), jnp.float32)),
        grid=(B, n_q),
        in_specs=[pl.BlockSpec((1, H, tq, d_k), _q_index_map(q_hblk)),
                  pl.BlockSpec((1, H, Lk, d_k), _kv_index_map(k_hblk)),   # resident across qi
                  pl.BlockSpec((1, H, Lk, d_v), _kv_index_map(v_hblk)),   # resident across qi
                  pl.BlockSpec((1, tq, Lk), lambda b, qi: (b, qi, 0)),    # mask: per-batch only
                  pl.BlockSpec((1, tq, 1), lambda b, qi: (b, qi, 0))],
        out_specs=(pl.BlockSpec((1, tq, H * d_v), lambda b, qi: (b, qi, 0)),
                   pl.BlockSpec((H, 1, tq, Lk), lambda b, qi: (0, b, qi, 0))),
        compiler_params=_compiler_params(("parallel", "parallel"), fp(tq), cap),
    )(q_hm, k_hm, v_hm, mask_i8, kmask_i8)
    return out, attn


# ---------------------------------------------------------------------------
# Parameter preprocessing (hoisted out of the per-call path)
# ---------------------------------------------------------------------------
def prepare_params(raw):
    """raw weights use the PyTorch nn.Linear layout (d_out, d_in)."""
    return {
        "wT_q": jnp.transpose(raw["w_qs"]), "b_q": jnp.reshape(raw["b_qs"], (1, -1)),
        "wT_k": jnp.transpose(raw["w_ks"]), "b_k": jnp.reshape(raw["b_ks"], (1, -1)),
        "wT_v": jnp.transpose(raw["w_vs"]), "b_v": jnp.reshape(raw["b_vs"], (1, -1)),
        "wT_fc": jnp.transpose(raw["w_fc"]), "b_fc": jnp.reshape(raw["b_fc"], (1, -1)),
        "wT_qkv": jnp.transpose(jnp.concatenate([raw["w_qs"], raw["w_ks"], raw["w_vs"]], axis=0)),
        "b_qkv": jnp.reshape(jnp.concatenate([raw["b_qs"], raw["b_ks"], raw["b_vs"]]), (1, -1)),
    }


# ---------------------------------------------------------------------------
# MultiHeadAttention2 forward
# ---------------------------------------------------------------------------
def multi_head_attention2(params, q, k, v, mask=None, k_mask=None, *, n_head, d_k, d_v,
                          precision="highest"):
    sz_b, len_q, d_model = q.shape
    len_k = k.shape[1]
    H = n_head

    if mask is None:
        mask = jnp.zeros((sz_b, len_q, len_k), jnp.int8)
    if k_mask is None:
        k_mask = jnp.zeros((sz_b, len_q, 1), jnp.int8)
    mask_i8 = mask.astype(jnp.int8)          # 4x less HBM/VMEM than int32; not head-replicated
    kmask_i8 = k_mask.astype(jnp.int8)
    inv_temperature = float(1.0 / np.power(d_k, 0.5))

    if (q is k) and (k is v) and (d_k == d_v):
        # Self-attention fast path: one fused QKV matmul + one head-major transpose of the
        # fused activation; the attention kernel slices the q/k/v head-blocks from the SAME
        # array via BlockSpecs (no wrapper-side qkv slicing round trip through HBM).
        qkv = pallas_linear(q.reshape(sz_b * len_q, d_model),
                            params["wT_qkv"], params["b_qkv"], precision=precision)
        qkv_hm = qkv.reshape(sz_b, len_q, 3 * H, d_k).transpose(0, 2, 1, 3)   # (B, 3H, L, d)
        out, attn4 = pallas_mha_attention(
            qkv_hm, qkv_hm, qkv_hm, mask_i8, kmask_i8,
            n_head=H, d_k=d_k, d_v=d_v, inv_temperature=inv_temperature,
            q_hblk=0, k_hblk=1, v_hblk=2, precision=precision)
    else:
        qp = pallas_linear(q.reshape(sz_b * len_q, d_model), params["wT_q"], params["b_q"],
                           precision=precision)
        kp = pallas_linear(k.reshape(sz_b * len_k, d_model), params["wT_k"], params["b_k"],
                           precision=precision)
        vp = pallas_linear(v.reshape(sz_b * len_k, d_model), params["wT_v"], params["b_v"],
                           precision=precision)
        # one cheap head-major transpose per tensor (linear in L) so the attention kernel
        # indexes heads along a leading axis (no sub-128-lane slicing inside the kernel).
        q_hm = qp.reshape(sz_b, len_q, H, d_k).transpose(0, 2, 1, 3)
        k_hm = kp.reshape(sz_b, len_k, H, d_k).transpose(0, 2, 1, 3)
        v_hm = vp.reshape(sz_b, len_k, H, d_v).transpose(0, 2, 1, 3)
        out, attn4 = pallas_mha_attention(
            q_hm, k_hm, v_hm, mask_i8, kmask_i8,
            n_head=H, d_k=d_k, d_v=d_v, inv_temperature=inv_temperature,
            precision=precision)

    attn = attn4.reshape(H * sz_b, len_q, len_k)   # torch index = h*sz_b + b (pure reshape)

    # out is already (sz_b, len_q, n_head*d_v) in the permute(1,2,0,3) layout
    out = pallas_linear(out.reshape(sz_b * len_q, H * d_v), params["wT_fc"], params["b_fc"],
                        precision=precision)
    out = out.reshape(sz_b, len_q, d_model)
    # TODO(synk): self.dropout is eval-mode identity (training-mode stochastic dropout omitted);
    #             self.layer_norm is declared in __init__ but never used in the reference forward.
    return out, attn


# ---------------------------------------------------------------------------
# Pure-JAX reference for verification (mirrors the PyTorch forward)
# ---------------------------------------------------------------------------
def reference_mha2(raw, q, k, v, mask, k_mask, *, n_head, d_k, d_v):
    sz_b, len_q, _ = q.shape
    len_k = k.shape[1]

    def lin(x, w, b):
        return x @ w.T + b

    qp = lin(q, raw["w_qs"], raw["b_qs"]).reshape(sz_b, len_q, n_head, d_k)
    kp = lin(k, raw["w_ks"], raw["b_ks"]).reshape(sz_b, len_k, n_head, d_k)
    vp = lin(v, raw["w_vs"], raw["b_vs"]).reshape(sz_b, len_k, n_head, d_v)
    qp = qp.transpose(2, 0, 1, 3).reshape(-1, len_q, d_k)
    kp = kp.transpose(2, 0, 1, 3).reshape(-1, len_k, d_k)
    vp = vp.transpose(2, 0, 1, 3).reshape(-1, len_k, d_v)
    mask_r = jnp.tile(mask, (n_head, 1, 1)) != 0
    k_mask_r = jnp.tile(k_mask, (n_head, 1, 1)) != 0

    attn = jnp.einsum("bqd,bkd->bqk", qp, kp) / float(np.power(d_k, 0.5))
    attn = jnp.where(mask_r, -jnp.inf, attn)
    attn = jax.nn.softmax(attn, axis=2)
    out = jnp.einsum("bqk,bkd->bqd", attn, vp)
    out = jnp.where(k_mask_r, 0.0, out)
    out = out.reshape(n_head, sz_b, len_q, d_v).transpose(1, 2, 0, 3).reshape(sz_b, len_q, -1)
    out = lin(out, raw["w_fc"], raw["b_fc"])
    return out, attn


if __name__ == "__main__":
    n_head, d_model, d_k, d_v = 2, 32, 8, 8
    sz_b, len_q, len_kv = 2, 8, 16

    key = jax.random.PRNGKey(0)
    keys = jax.random.split(key, 16)

    # deterministic synthetic parameters (PyTorch nn.Linear layout: (out, in))
    raw_params = {
        "w_qs": jax.random.normal(keys[0], (n_head * d_k, d_model), jnp.float32) * 0.1,
        "b_qs": jax.random.normal(keys[1], (n_head * d_k,), jnp.float32) * 0.1,
        "w_ks": jax.random.normal(keys[2], (n_head * d_k, d_model), jnp.float32) * 0.1,
        "b_ks": jax.random.normal(keys[3], (n_head * d_k,), jnp.float32) * 0.1,
        "w_vs": jax.random.normal(keys[4], (n_head * d_v, d_model), jnp.float32) * 0.1,
        "b_vs": jax.random.normal(keys[5], (n_head * d_v,), jnp.float32) * 0.1,
        "w_fc": jax.random.normal(keys[6], (d_model, n_head * d_v), jnp.float32) * 0.1,
        "b_fc": jax.random.normal(keys[7], (d_model,), jnp.float32) * 0.1,
    }
    params = prepare_params(raw_params)          # one-time weight preprocessing

    # ---- case 1: cross-attention (distinct q/k/v, len_q != len_k) ----
    q = jax.random.normal(keys[8], (sz_b, len_q, d_model), jnp.float32)
    k = jax.random.normal(keys[9], (sz_b, len_kv, d_model), jnp.float32)
    v = jax.random.normal(keys[10], (sz_b, len_kv, d_model), jnp.float32)
    mask_bool = jax.random.uniform(keys[11], (sz_b, len_q, len_kv)) > 0.8
    mask_bool = mask_bool.at[:, :, 0].set(False)      # keep every row partially unmasked
    mask = mask_bool.astype(jnp.int32)
    k_mask = jnp.zeros((sz_b, len_q, 1), jnp.int32).at[:, -1, :].set(1)

    out, attn = multi_head_attention2(params, q, k, v, mask, k_mask,
                                      n_head=n_head, d_k=d_k, d_v=d_v)
    out = jax.block_until_ready(out)
    attn = jax.block_until_ready(attn)
    ref_out, ref_attn = reference_mha2(raw_params, q, k, v, mask, k_mask,
                                       n_head=n_head, d_k=d_k, d_v=d_v)
    np.testing.assert_allclose(np.asarray(out), np.asarray(ref_out), rtol=1e-5, atol=1e-5)
    np.testing.assert_allclose(np.asarray(attn), np.asarray(ref_attn), rtol=1e-5, atol=1e-5)

    # ---- case 2: self-attention (q is k is v -> fused QKV projection path) ----
    x = jax.random.normal(keys[12], (sz_b, len_q, d_model), jnp.float32)
    mask_s = (jax.random.uniform(keys[13], (sz_b, len_q, len_q)) > 0.8)
    mask_s = mask_s.at[:, :, 0].set(False)
    mask_s = mask_s.astype(jnp.int32)
    k_mask_s = jnp.zeros((sz_b, len_q, 1), jnp.int32).at[:, 0, :].set(1)

    out2, attn2 = multi_head_attention2(params, x, x, x, mask_s, k_mask_s,
                                        n_head=n_head, d_k=d_k, d_v=d_v)
    out2 = jax.block_until_ready(out2)
    attn2 = jax.block_until_ready(attn2)
    ref_out2, ref_attn2 = reference_mha2(raw_params, x, x, x, mask_s, k_mask_s,
                                         n_head=n_head, d_k=d_k, d_v=d_v)
    np.testing.assert_allclose(np.asarray(out2), np.asarray(ref_out2), rtol=1e-5, atol=1e-5)
    np.testing.assert_allclose(np.asarray(attn2), np.asarray(ref_attn2), rtol=1e-5, atol=1e-5)

    # ---- case 3: fast precision path (bf16 MXU operands + approx softmax reciprocal) ----
    out3, attn3 = multi_head_attention2(params, x, x, x, mask_s, k_mask_s,
                                        n_head=n_head, d_k=d_k, d_v=d_v, precision="fast")
    out3 = jax.block_until_ready(out3)
    attn3 = jax.block_until_ready(attn3)
    np.testing.assert_allclose(np.asarray(out3), np.asarray(ref_out2), rtol=1e-1, atol=1e-1)
    np.testing.assert_allclose(np.asarray(attn3), np.asarray(ref_attn2), rtol=1e-1, atol=1e-1)

    print("KERNEL_OK")
</pallas_src>

<mosaic_0001>
module attributes {stable_mosaic.version = 11 : i64} {
  func.func @_linear_kernel(%arg0: i32, %arg1: memref<16x32xf32, #tpu.memory_space<vmem>>, %arg2: memref<32x16xf32, #tpu.memory_space<vmem>>, %arg3: memref<1x16xf32, #tpu.memory_space<vmem>>, %arg4: memref<16x16xf32, #tpu.memory_space<vmem>>) attributes {dimension_semantics = [#tpu.dimension_semantics<parallel>], iteration_bounds = array<i64: 1>, scalar_prefetch = 0 : i64, scratch_operands = 0 : i64, tpu.core_type = #tpu.core_type<tc>, window_params = [{transform_indices = @transform_0, window_bounds = array<i64: 16, 32>}, {pipeline_mode = #tpu.pipeline_mode<synchronous>, transform_indices = @transform_1, window_bounds = array<i64: 32, 16>}, {pipeline_mode = #tpu.pipeline_mode<synchronous>, transform_indices = @transform_2, window_bounds = array<i64: 1, 16>}, {transform_indices = @transform_3, window_bounds = array<i64: 16, 16>}]} {
    %c0 = arith.constant 0 : index
    %c0_0 = arith.constant 0 : index
    %0 = vector.load %arg1[%c0, %c0_0] : memref<16x32xf32, #tpu.memory_space<vmem>>, vector<16x32xf32>
    %c0_1 = arith.constant 0 : index
    %c0_2 = arith.constant 0 : index
    %1 = vector.load %arg2[%c0_1, %c0_2] : memref<32x16xf32, #tpu.memory_space<vmem>>, vector<32x16xf32>
    %cst = arith.constant dense<0.000000e+00> : vector<16x16xf32>
    %2 = tpu.matmul %0, %1, %cst {dimension_numbers = #tpu.dot_dimension_numbers<[1], [0], [0], [1], [0, 0, 1, 1], [], []>} : vector<16x32xf32>, vector<32x16xf32>, vector<16x16xf32> -> vector<16x16xf32>
    %c0_3 = arith.constant 0 : index
    %c0_4 = arith.constant 0 : index
    %3 = vector.load %arg3[%c0_3, %c0_4] : memref<1x16xf32, #tpu.memory_space<vmem>>, vector<1x16xf32>
    %4 = vector.broadcast %3 : vector<1x16xf32> to vector<16x16xf32>
    %5 = arith.addf %2, %4 : vector<16x16xf32>
    %c0_5 = arith.constant 0 : index
    %c0_6 = arith.constant 0 : index
    %6 = vector.load %arg4[%c0_5, %c0_6] : memref<16x16xf32, #tpu.memory_space<vmem>>, vector<16x16xf32>
    tpu.vector_store %arg4[%c0_5, %c0_6], %5 {strides = array<i32>} : memref<16x16xf32, #tpu.memory_space<vmem>>, vector<16x16xf32>,
    return
  }
  func.func @transform_0(%arg0: i32) -> (i32, i32) {
    %c0_i32 = arith.constant 0 : i32
    %c0_i32_0 = arith.constant 0 : i32
    return %arg0, %c0_i32 : i32, i32
  }
  func.func @transform_1(%arg0: i32) -> (i32, i32) {
    %c0_i32 = arith.constant 0 : i32
    %c0_i32_0 = arith.constant 0 : i32
    %c0_i32_1 = arith.constant 0 : i32
    return %c0_i32, %c0_i32_0 : i32, i32
  }
  func.func @transform_2(%arg0: i32) -> (i32, i32) {
    %c0_i32 = arith.constant 0 : i32
    %c0_i32_0 = arith.constant 0 : i32
    %c0_i32_1 = arith.constant 0 : i32
    return %c0_i32, %c0_i32_0 : i32, i32
  }
  func.func @transform_3(%arg0: i32) -> (i32, i32) {
    %c0_i32 = arith.constant 0 : i32
    %c0_i32_0 = arith.constant 0 : i32
    return %arg0, %c0_i32 : i32, i32
  }
}

</mosaic_0001>

<bundles_post_ra>
// kernel: tpu_custom_call.1
= control target key start
LH: loop header
LB: loop body
LE: loop exit
PB: predicated region body
PF: predicated region fallthrough
CT: control target
= control target key end

     0   :  { %vm28_vm0 = vcmask 261120   ;;  %s221_s0 = inlined_call_operand.vmem [shape: f32[16,32], index: 0, kind: input, shape index: {}]   ;;  %s222_s1 = inlined_call_operand.vmem [shape: f32[32,16], index: 1, kind: input, shape index: {}]   ;;  %s223_s2 = inlined_call_operand.vmem [shape: f32[1,16], index: 2, kind: input, shape index: {}]   ;;  %s224_s3 = inlined_call_operand.hbm [shape: f32[16,16], index: 3, kind: output, shape index: {}]  }
   0x1   :  { %v20_v0 = vld [vmem:[%s222_s1 + $0x18] sm:$0xff]  ;;  %v19_v1 = vld [vmem:[%s222_s1 + $0x10] sm:$0xff]  ;;  %v15_v2 = vld [vmem:[%s221_s0] sm:$0xff] }
   0x2   :  { %138 = vmatprep.subr.mxu0 %v20_v0  ;;  %v18_v3 = vld [vmem:[%s222_s1 + $0x8] sm:$0xff]  ;;  %146 = vmatprep.mubr.msk.f32.mxu0 %vm28_vm0, %v15_v2 }
   0x3   :  { %139 = vmatpush3.msra.mxu0 %v20_v0 }
   0x4   :  { %8 = vsyncpa [#allocation3], 0  ;;  %140 = vmatprep.subr.mxu0 %v19_v1  ;;  %v17_v4 = vld [vmem:[%s222_s1] sm:$0xff]  ;;  %v16_v5 = vld [vmem:[%s221_s0 + $0x8] sm:$0xff]  ;;  %s174_s26 = smov [#allocation2]   ;;  %vm110_vm1 = vcmask 130048  }
   0x5   :  { %141 = vmatpush3.msra.mxu0 %v19_v1  ;;  %v129_v6 = vld [vmem:[%s223_s2] ss:$0 sm:$0xff]  ;;  %s118_s27 = sshll.u32 %s174_s26, 4  ;;  %s119_s27 = int_to_ptr.vmem [resolvable:$true] %s118_s27 }
   0x6   :  { %142 = vmatprep.subr.mxu0 %v18_v3  ;;  %s152_s1 = scalar_lea.vmem %s119_s27, 256  ;;  %p157_p1 = scmp.lt.s32.totalorder %s119_s27, %s119_s27 }
   0x7   :  { %143 = vmatpush3.msra.mxu0 %v18_v3  ;;  %p153_p0 = scmp.ne.s32.totalorder %s119_s27, %s152_s1  ;;  %p158_p2 = scmp.lt.s32.totalorder %s152_s1, %s152_s1 }
   0x8   :  { %144 = vmatprep.subr.mxu0 %v17_v4 }
   0x9   :  { %145 = vmatpush3.msra.mxu0 %v17_v4  ;;  %p159_p3 = por %p158_p2, %p157_p1 }
   0xa   :  { %147 = vmatmul.mubr.msk.f32.vlgmr.msra.gmra.mxu0 %vm28_vm0, %v16_v5 }
   0xb   :  { %p160_p4 = pnand %p159_p3, %p153_p0 }
  0xca   :  { %v148_v7 = vpop.f32.mrf.mxu0 }
  0xcb   :  { %v107_v8 = vadd.f32 %v148_v7, %v129_v6 }
  0xcc   :  { %v101_v9 = vpop.f32.mrf.mxu0 }
  0xcd   :  { %112 = vst.msk [vmem:[#allocation2 + $0x8] sm:$0xff] %vm110_vm1, %v107_v8  ;;  %v102_v10 = vadd.f32 %v129_v6, %v101_v9 }
  0xcf   :  { %111 = vst.msk [vmem:[#allocation2] sm:$0xff] %vm110_vm1, %v102_v10 }
  0xd0   :  { %163 = shalt.err (!%p160_p4)
}
  0xd1   :  { %s175_s0 = smov 128   ;;  %s176_s28 = smov 8  }
  0xd2   :  { %124 = dma.vmem_to_hbm [thread:$0]  %s119_s27, 256, %s224_s3, [#allocation3], %s175_s0, %s175_s0, %s176_s28  }
  0xd3   :  { %172 = dma.done.wait [#allocation3], 256  }
  0xd4   :  { %173 = vsyncadd [#allocation3], 4294967040 }
  0xd5   :  { %128 = vsyncpa [#allocation3], 1 }

</bundles_post_ra>
